<compile_context>
chip_gen: v6e
topology: v6e:2x2x1
jax: 0.10.0
libtpu: 0.0.40
codegen_flags: <defaults>
</compile_context>

<pallas_src>
import functools
import math

import jax
import jax.numpy as jnp
from jax import lax
from jax.experimental import pallas as pl
from jax.experimental.pallas import tpu as pltpu


def _round_up(v, m):
    return ((v + m - 1) // m) * m


# ---------------------------------------------------------------------------
# Kernels
# ---------------------------------------------------------------------------
def _noisy_linear_kernel(x_ref, wmu_ref, wsig_ref, eout_ref, ein_ref, beff_ref,
                         o_ref, acc_ref, *, mxu_dtype):
    """Training-mode tile: W = mu + sigma * (eps_out x eps_in); y += x @ W.T."""
    k = pl.program_id(1)

    @pl.when(k == 0)
    def _():
        acc_ref[...] = jnp.zeros_like(acc_ref)

    # Factorised noise, fused on the VPU (free filler under the weight DMA).
    # Weight construction stays in f32 (v5e has no bf16 VPU); cast at the dot.
    w = wmu_ref[...] + wsig_ref[...] * (eout_ref[...] * ein_ref[...])  # (tn, tk)

    # Transposed-RHS contraction on K of both operands: no weight transpose.
    acc_ref[...] += lax.dot_general(
        x_ref[...].astype(mxu_dtype), w.astype(mxu_dtype),
        dimension_numbers=(((1,), (1,)), ((), ())),
        preferred_element_type=jnp.float32)

    @pl.when(k == pl.num_programs(1) - 1)
    def _():
        o_ref[...] = (acc_ref[...] + beff_ref[...]).astype(o_ref.dtype)


def _plain_linear_kernel(x_ref, w_ref, b_ref, o_ref, acc_ref, *, mxu_dtype):
    """Eval-mode fast path: plain linear on mu parameters (no noise streams)."""
    k = pl.program_id(1)

    @pl.when(k == 0)
    def _():
        acc_ref[...] = jnp.zeros_like(acc_ref)

    acc_ref[...] += lax.dot_general(
        x_ref[...].astype(mxu_dtype), w_ref[...].astype(mxu_dtype),
        dimension_numbers=(((1,), (1,)), ((), ())),
        preferred_element_type=jnp.float32)

    @pl.when(k == pl.num_programs(1) - 1)
    def _():
        o_ref[...] = (acc_ref[...] + b_ref[...]).astype(o_ref.dtype)


# ---------------------------------------------------------------------------
# Wrapper
# ---------------------------------------------------------------------------
def noisy_linear(x, weight_mu, weight_sigma, eps_out, eps_in,
                 bias_mu, bias_sigma, bias_epsilon, *,
                 training=True, mxu_dtype=jnp.bfloat16, tn=256, tk=512):
    """Forward pass of NoisyLinear.

    x:                 (B, in_features)  f32
    weight_mu/sigma:   (out_features, in_features) f32
    eps_out / eps_in:  (out_features,) / (in_features,) factorised noise vectors
                       (weight_epsilon == outer(eps_out, eps_in))
    bias_*:            (out_features,) f32
    returns:           (B, out_features) f32
    """
    B, K = x.shape
    N = weight_mu.shape[0]

    # Tile sizes: lane-axis multiples of 128 (256 preferred on v6e/v7x),
    # clamped to the padded problem size.
    tn = min(tn, _round_up(N, 128))
    tk = min(tk, _round_up(K, 128))
    B_pad = _round_up(B, 8)
    N_pad = _round_up(N, tn)
    K_pad = _round_up(K, tk)

    # Wrapper-side zero padding: (8,128) tiling compliance + lane-dense stores.
    xp = jnp.pad(x, ((0, B_pad - B), (0, K_pad - K)))
    wmu = jnp.pad(weight_mu, ((0, N_pad - N), (0, K_pad - K)))

    if training:
        b_eff = bias_mu + bias_sigma * bias_epsilon          # tiny (N,) glue op
    else:
        b_eff = bias_mu
    beff = jnp.pad(b_eff, (0, N_pad - N)).reshape(1, N_pad)

    grid = (N_pad // tn, K_pad // tk)
    compiler_params = pltpu.CompilerParams(
        dimension_semantics=("parallel", "arbitrary"),
        vmem_limit_bytes=32 * 1024 * 1024)   # fits v5e/v6e/v7x scoped VMEM

    x_spec = pl.BlockSpec((B_pad, tk), lambda n, k: (0, k))
    w_spec = pl.BlockSpec((tn, tk), lambda n, k: (n, k))
    b_spec = pl.BlockSpec((1, tn), lambda n, k: (0, n))
    out_spec = pl.BlockSpec((B_pad, tn), lambda n, k: (0, n))
    scratch = [pltpu.VMEM((B_pad, tn), jnp.float32)]

    if training:
        wsig = jnp.pad(weight_sigma, ((0, N_pad - N), (0, K_pad - K)))
        eout = jnp.pad(eps_out, (0, N_pad - N)).reshape(N_pad, 1)
        ein = jnp.pad(eps_in, (0, K_pad - K)).reshape(1, K_pad)
        kernel = functools.partial(_noisy_linear_kernel, mxu_dtype=mxu_dtype)
        in_specs = [
            x_spec,                                     # x
            w_spec,                                     # weight_mu
            w_spec,                                     # weight_sigma
            pl.BlockSpec((tn, 1), lambda n, k: (n, 0)),  # eps_out (column)
            pl.BlockSpec((1, tk), lambda n, k: (0, k)),  # eps_in  (row)
            b_spec,                                     # effective bias
        ]
        args = (xp, wmu, wsig, eout, ein, beff)
    else:
        # Eval fast path: no sigma / epsilon streams at all.
        kernel = functools.partial(_plain_linear_kernel, mxu_dtype=mxu_dtype)
        in_specs = [x_spec, w_spec, b_spec]
        args = (xp, wmu, beff)

    out = pl.pallas_call(
        kernel,
        out_shape=jax.ShapeDtypeStruct((B_pad, N_pad), jnp.float32),
        grid_spec=pltpu.PrefetchScalarGridSpec(
            num_scalar_prefetch=0,
            grid=grid,
            in_specs=in_specs,
            out_specs=out_spec,
            scratch_shapes=scratch),
        compiler_params=compiler_params,
    )(*args)

    # TODO(synk): if noise is held fixed across many rollout steps, precompute
    # W_eff = mu + sigma*eps once per reset_noise and call the eval-path kernel
    # on it (1 weight stream instead of 2 per call).
    return out[:B, :N]


# ---------------------------------------------------------------------------
# Deterministic parameter / noise initialization (mirrors the PyTorch module).
# ---------------------------------------------------------------------------
def _scale_noise(key, size):
    z = jax.random.normal(key, (size,), dtype=jnp.float32)
    return jnp.sign(z) * jnp.sqrt(jnp.abs(z))


def init_noisy_linear(key, in_features, out_features, std_init=0.4):
    k_wmu, k_bmu, k_ein, k_eout, k_beps = jax.random.split(key, 5)
    mu_range = 1.0 / math.sqrt(in_features)

    weight_mu = jax.random.uniform(k_wmu, (out_features, in_features),
                                   minval=-mu_range, maxval=mu_range,
                                   dtype=jnp.float32)
    weight_sigma = jnp.full((out_features, in_features),
                            std_init / math.sqrt(in_features), jnp.float32)
    bias_mu = jax.random.uniform(k_bmu, (out_features,),
                                 minval=-mu_range, maxval=mu_range,
                                 dtype=jnp.float32)
    bias_sigma = jnp.full((out_features,),
                          std_init / math.sqrt(out_features), jnp.float32)

    # reset_noise: factorised Gaussian noise (kept factorised -- the dense
    # outer product is never needed on the hot path).
    eps_in = _scale_noise(k_ein, in_features)
    eps_out = _scale_noise(k_eout, out_features)
    bias_epsilon = _scale_noise(k_beps, out_features)

    return dict(weight_mu=weight_mu, weight_sigma=weight_sigma,
                eps_out=eps_out, eps_in=eps_in,
                bias_mu=bias_mu, bias_sigma=bias_sigma,
                bias_epsilon=bias_epsilon)


if __name__ == "__main__":
    key = jax.random.PRNGKey(0)
    k_params, k_x = jax.random.split(key)

    in_features, out_features, batch = 32, 64, 8
    params = init_noisy_linear(k_params, in_features, out_features)
    x = jax.random.normal(k_x, (batch, in_features), dtype=jnp.float32)

    # Plain-JAX reference (identical to the PyTorch forward).
    w_eps_dense = jnp.outer(params["eps_out"], params["eps_in"])
    w_eff = params["weight_mu"] + params["weight_sigma"] * w_eps_dense
    b_eff = params["bias_mu"] + params["bias_sigma"] * params["bias_epsilon"]
    ref_train = x @ w_eff.T + b_eff
    ref_eval = x @ params["weight_mu"].T + params["bias_mu"]

    # 1) Training path, f32 MXU inputs -- strict structural/numerical check.
    out_f32 = noisy_linear(x, params["weight_mu"], params["weight_sigma"],
                           params["eps_out"], params["eps_in"],
                           params["bias_mu"], params["bias_sigma"],
                           params["bias_epsilon"],
                           training=True, mxu_dtype=jnp.float32)
    out_f32 = jax.block_until_ready(out_f32)
    assert out_f32.shape == (batch, out_features)
    assert jnp.allclose(out_f32, ref_train, atol=1e-5, rtol=1e-5)

    # 2) Training path, bf16 MXU inputs / f32 accumulation (v6e/v7x fast path).
    out_bf16 = noisy_linear(x, params["weight_mu"], params["weight_sigma"],
                            params["eps_out"], params["eps_in"],
                            params["bias_mu"], params["bias_sigma"],
                            params["bias_epsilon"],
                            training=True, mxu_dtype=jnp.bfloat16)
    out_bf16 = jax.block_until_ready(out_bf16)
    assert jnp.allclose(out_bf16, ref_train, atol=5e-2, rtol=5e-2)

    # 3) Eval fast path: mu-only plain linear, no epsilon streams.
    out_eval = noisy_linear(x, params["weight_mu"], params["weight_sigma"],
                            params["eps_out"], params["eps_in"],
                            params["bias_mu"], params["bias_sigma"],
                            params["bias_epsilon"],
                            training=False, mxu_dtype=jnp.float32)
    out_eval = jax.block_until_ready(out_eval)
    assert jnp.allclose(out_eval, ref_eval, atol=1e-5, rtol=1e-5)

    print("KERNEL_OK")
</pallas_src>

<mosaic_0001>
module attributes {stable_mosaic.version = 11 : i64} {
  func.func @_noisy_linear_kernel(%arg0: i32, %arg1: i32, %arg2: memref<8x128xf32, #tpu.memory_space<vmem>>, %arg3: memref<128x128xf32, #tpu.memory_space<vmem>>, %arg4: memref<128x128xf32, #tpu.memory_space<vmem>>, %arg5: memref<128x1xf32, #tpu.memory_space<vmem>>, %arg6: memref<1x128xf32, #tpu.memory_space<vmem>>, %arg7: memref<1x128xf32, #tpu.memory_space<vmem>>, %arg8: memref<8x128xf32, #tpu.memory_space<vmem>>, %arg9: memref<8x128xf32, #tpu.memory_space<vmem>>) attributes {dimension_semantics = [#tpu.dimension_semantics<parallel>, #tpu.dimension_semantics<arbitrary>], iteration_bounds = array<i64: 1, 1>, scalar_prefetch = 0 : i64, scratch_operands = 1 : i64, tpu.core_type = #tpu.core_type<tc>, window_params = [{transform_indices = @transform_0, window_bounds = array<i64: 8, 128>}, {transform_indices = @transform_1, window_bounds = array<i64: 128, 128>}, {transform_indices = @transform_2, window_bounds = array<i64: 128, 128>}, {transform_indices = @transform_3, window_bounds = array<i64: 128, 1>}, {transform_indices = @transform_4, window_bounds = array<i64: 1, 128>}, {transform_indices = @transform_5, window_bounds = array<i64: 1, 128>}, {transform_indices = @transform_6, window_bounds = array<i64: 8, 128>}]} {
    %c0_i32 = arith.constant 0 : i32
    %0 = arith.cmpi eq, %arg1, %c0_i32 : i32
    %1 = arith.extui %0 : i1 to i32
    %c0_i32_0 = arith.constant 0 : i32
    %2 = arith.cmpi ne, %1, %c0_i32_0 : i32
    scf.if %2 {
      %cst_16 = arith.constant 0.000000e+00 : f32
      %20 = vector.broadcast %cst_16 : f32 to vector<8x128xf32>
      %c0_17 = arith.constant 0 : index
      %c0_18 = arith.constant 0 : index
      %21 = vector.load %arg9[%c0_17, %c0_18] : memref<8x128xf32, #tpu.memory_space<vmem>>, vector<8x128xf32>
      tpu.vector_store %arg9[%c0_17, %c0_18], %20 {strides = array<i32>} : memref<8x128xf32, #tpu.memory_space<vmem>>, vector<8x128xf32>,
    } else {
    }
    %c0 = arith.constant 0 : index
    %c0_1 = arith.constant 0 : index
    %3 = vector.load %arg3[%c0, %c0_1] : memref<128x128xf32, #tpu.memory_space<vmem>>, vector<128x128xf32>
    %c0_2 = arith.constant 0 : index
    %c0_3 = arith.constant 0 : index
    %4 = vector.load %arg4[%c0_2, %c0_3] : memref<128x128xf32, #tpu.memory_space<vmem>>, vector<128x128xf32>
    %c0_4 = arith.constant 0 : index
    %c0_5 = arith.constant 0 : index
    %5 = vector.load %arg5[%c0_4, %c0_5] : memref<128x1xf32, #tpu.memory_space<vmem>>, vector<128x1xf32>
    %c0_6 = arith.constant 0 : index
    %c0_7 = arith.constant 0 : index
    %6 = vector.load %arg6[%c0_6, %c0_7] : memref<1x128xf32, #tpu.memory_space<vmem>>, vector<1x128xf32>
    %7 = vector.broadcast %5 : vector<128x1xf32> to vector<128x128xf32>
    %8 = vector.broadcast %6 : vector<1x128xf32> to vector<128x128xf32>
    %9 = arith.mulf %7, %8 : vector<128x128xf32>
    %10 = arith.mulf %4, %9 : vector<128x128xf32>
    %11 = arith.addf %3, %10 : vector<128x128xf32>
    %c0_8 = arith.constant 0 : index
    %c0_9 = arith.constant 0 : index
    %12 = vector.load %arg9[%c0_8, %c0_9] : memref<8x128xf32, #tpu.memory_space<vmem>>, vector<8x128xf32>
    %c0_10 = arith.constant 0 : index
    %c0_11 = arith.constant 0 : index
    %13 = vector.load %arg2[%c0_10, %c0_11] : memref<8x128xf32, #tpu.memory_space<vmem>>, vector<8x128xf32>
    %cst = arith.constant dense<0.000000e+00> : vector<8x128xf32>
    %14 = tpu.matmul %13, %11, %cst {dimension_numbers = #tpu.dot_dimension_numbers<[1], [1], [0], [0], [0, 0, 1, 0], [], []>} : vector<8x128xf32>, vector<128x128xf32>, vector<8x128xf32> -> vector<8x128xf32>
    %15 = arith.addf %12, %14 : vector<8x128xf32>
    %c0_12 = arith.constant 0 : index
    %c0_13 = arith.constant 0 : index
    %16 = vector.load %arg9[%c0_12, %c0_13] : memref<8x128xf32, #tpu.memory_space<vmem>>, vector<8x128xf32>
    tpu.vector_store %arg9[%c0_12, %c0_13], %15 {strides = array<i32>} : memref<8x128xf32, #tpu.memory_space<vmem>>, vector<8x128xf32>,
    %c0_i32_14 = arith.constant 0 : i32
    %17 = arith.cmpi eq, %arg1, %c0_i32_14 : i32
    %18 = arith.extui %17 : i1 to i32
    %c0_i32_15 = arith.constant 0 : i32
    %19 = arith.cmpi ne, %18, %c0_i32_15 : i32
    scf.if %19 {
      %c0_16 = arith.constant 0 : index
      %c0_17 = arith.constant 0 : index
      %20 = vector.load %arg9[%c0_16, %c0_17] : memref<8x128xf32, #tpu.memory_space<vmem>>, vector<8x128xf32>
      %c0_18 = arith.constant 0 : index
      %c0_19 = arith.constant 0 : index
      %21 = vector.load %arg7[%c0_18, %c0_19] : memref<1x128xf32, #tpu.memory_space<vmem>>, vector<1x128xf32>
      %22 = vector.broadcast %21 : vector<1x128xf32> to vector<8x128xf32>
      %23 = arith.addf %20, %22 : vector<8x128xf32>
      %c0_20 = arith.constant 0 : index
      %c0_21 = arith.constant 0 : index
      %24 = vector.load %arg8[%c0_20, %c0_21] : memref<8x128xf32, #tpu.memory_space<vmem>>, vector<8x128xf32>
      tpu.vector_store %arg8[%c0_20, %c0_21], %23 {strides = array<i32>} : memref<8x128xf32, #tpu.memory_space<vmem>>, vector<8x128xf32>,
    } else {
    }
    return
  }
  func.func @transform_0(%arg0: i32, %arg1: i32) -> (i32, i32) {
    %c0_i32 = arith.constant 0 : i32
    %c0_i32_0 = arith.constant 0 : i32
    return %c0_i32, %arg1 : i32, i32
  }
  func.func @transform_1(%arg0: i32, %arg1: i32) -> (i32, i32) {
    %c0_i32 = arith.constant 0 : i32
    return %arg0, %arg1 : i32, i32
  }
  func.func @transform_2(%arg0: i32, %arg1: i32) -> (i32, i32) {
    %c0_i32 = arith.constant 0 : i32
    return %arg0, %arg1 : i32, i32
  }
  func.func @transform_3(%arg0: i32, %arg1: i32) -> (i32, i32) {
    %c0_i32 = arith.constant 0 : i32
    %c0_i32_0 = arith.constant 0 : i32
    return %arg0, %c0_i32 : i32, i32
  }
  func.func @transform_4(%arg0: i32, %arg1: i32) -> (i32, i32) {
    %c0_i32 = arith.constant 0 : i32
    %c0_i32_0 = arith.constant 0 : i32
    return %c0_i32, %arg1 : i32, i32
  }
  func.func @transform_5(%arg0: i32, %arg1: i32) -> (i32, i32) {
    %c0_i32 = arith.constant 0 : i32
    %c0_i32_0 = arith.constant 0 : i32
    return %c0_i32, %arg0 : i32, i32
  }
  func.func @transform_6(%arg0: i32, %arg1: i32) -> (i32, i32) {
    %c0_i32 = arith.constant 0 : i32
    %c0_i32_0 = arith.constant 0 : i32
    return %c0_i32, %arg0 : i32, i32
  }
}

</mosaic_0001>

<bundles_post_ra>
// kernel: tpu_custom_call.1
= control target key start
LH: loop header
LB: loop body
LE: loop exit
PB: predicated region body
PF: predicated region fallthrough
CT: control target
= control target key end

     0   :  { %11 = vsyncpa [#allocation4], 0  ;;  %s660_s0 = inlined_call_operand.hbm [shape: f32[8,128], index: 0, kind: input, shape index: {}]   ;;  %s661_s1 = inlined_call_operand.vmem [shape: f32[128,128], index: 1, kind: input, shape index: {}]   ;;  %s662_s2 = inlined_call_operand.hbm [shape: f32[128,128], index: 2, kind: input, shape index: {}]   ;;  %s663_s3 = inlined_call_operand.vmem [shape: f32[128,1], index: 3, kind: input, shape index: {}]   ;;  %s664_s4 = inlined_call_operand.vmem [shape: f32[1,128], index: 4, kind: input, shape index: {}]   ;;  %s665_s5 = inlined_call_operand.vmem [shape: f32[1,128], index: 5, kind: input, shape index: {}]   ;;  %s666_s6 = inlined_call_operand.hbm [shape: f32[8,128], index: 6, kind: output, shape index: {}]  }
   0x1   :  { %12 = vsyncpa [#allocation7], 0 }
   0x2   :  { %13 = vsyncpa [#allocation5], 0  ;;  %s471_s21 = smov [#allocation3]   ;;  %s472_s23 = smov [#allocation6]  }
   0x3   :  { %s20_s22 = sshll.u32 %s471_s21, 4  ;;  %s31_s24 = sshll.u32 %s472_s23, 4  ;;  %s21_s22 = int_to_ptr.vmem [resolvable:$true] %s20_s22  ;;  %s32_s24 = int_to_ptr.vmem [resolvable:$true] %s31_s24 }
   0x4   :  { %s413_s25 = scalar_lea.vmem %s21_s22, 128  ;;  %p418_p1 = scmp.lt.s32.totalorder %s21_s22, %s21_s22 }
   0x5   :  { %p414_p0 = scmp.ne.s32.totalorder %s21_s22, %s413_s25  ;;  %p419_p2 = scmp.lt.s32.totalorder %s413_s25, %s413_s25 }
   0x7   :  { %p420_p3 = por %p419_p2, %p418_p1 }
   0x9   :  { %p421_p4 = pnand %p420_p3, %p414_p0 }
   0xb   :  { %424 = shalt.err (!%p421_p4)
}
   0xc   :  { %23 = dma.hbm_to_vmem [thread:$0]  %s660_s0, 128, %s21_s22, [#allocation4]  }
   0xd   :  { %s433_s28 = scalar_lea.vmem %s32_s24, 2048  ;;  %p438_p6 = scmp.lt.s32.totalorder %s32_s24, %s32_s24 }
   0xe   :  { %p434_p5 = scmp.ne.s32.totalorder %s32_s24, %s433_s28  ;;  %p439_p7 = scmp.lt.s32.totalorder %s433_s28, %s433_s28 }
  0x10   :  { %p440_p8 = por %p439_p7, %p438_p6 }
  0x12   :  { %p441_p9 = pnand %p440_p8, %p434_p5 }
  0x14   :  { %444 = shalt.err (!%p441_p9)
}
  0x15   :  { %s473_s29 = smov 128   ;;  %s474_s30 = smov 8  }
  0x16   :  { %37 = dma.hbm_to_vmem [thread:$0]  %s662_s2, 2048, %s32_s24, [#allocation7], %s473_s29, %s473_s29, %s474_s30  }
  0x17   :  { %465 = dma.done.wait [#allocation4], 128  }
  0x18   :  { %466 = vsyncadd [#allocation4], 4294967168 }
  0x19   :  { %467 = dma.done.wait [#allocation7], 2048  }
  0x1a   :  { %468 = vsyncadd [#allocation7], 4294965248  ;;  %v475_v0 = vmov 0   ;;  %v102_v1 = vld [vmem:[%s663_s3 + $0x78] sm:$0xff]  ;;  %v100_v2 = vld [vmem:[%s663_s3 + $0x68] sm:$0xff]  ;;  %v476_v5 = vmov 0.0  }
  0x1b   :  { %404 = vset.pattern.permute.xlu1 %v475_v0  ;;  %403 = vset.pattern.permute.xlu0 %v475_v0  ;;  %v101_v3 = vld [vmem:[%s663_s3 + $0x70] sm:$0xff]  ;;  %v99_v4 = vld [vmem:[%s663_s3 + $0x60] sm:$0xff]  ;;  %v98_v6 = vld [vmem:[%s663_s3 + $0x58] sm:$0xff]  ;;  %vm477_vm0 = vmmov 0   ;;  %s478_s19 = smov [#allocation8]  }
  0x1c   :  { %181 = vperm.xlu0 %403, %v102_v1   ;;  %171 = vperm.xlu1 %404, %v100_v2   ;;  %v97_v7 = vld [vmem:[%s663_s3 + $0x50] sm:$0xff]  ;;  %v96_v8 = vld [vmem:[%s663_s3 + $0x48] sm:$0xff]  ;;  %v95_v9 = vld [vmem:[%s663_s3 + $0x40] sm:$0xff]  ;;  %s331_s20 = sshll.u32 %s478_s19, 4  ;;  %s332_s20 = int_to_ptr.vmem [resolvable:$true] %s331_s20 }
  0x1d   :  { %360 = vmatprep.subr.mxu0 %v476_v5  ;;  %v94_v10 = vld [vmem:[%s663_s3 + $0x38] sm:$0xff]  ;;  %v93_v11 = vld [vmem:[%s663_s3 + $0x30] sm:$0xff]  ;;  %v92_v12 = vld [vmem:[%s663_s3 + $0x28] sm:$0xff]  ;;  %392 = vmatprep.mubr.msk.f32.mxu0 %vm477_vm0, %v476_v5  ;;  %s445_s21 = scalar_lea.vmem %s332_s20, 128  ;;  %p450_p11 = scmp.lt.s32.totalorder %s332_s20, %s332_s20 }
  0x1e   :  { %v91_v13 = vld [vmem:[%s663_s3 + $0x20] sm:$0xff]  ;;  %v90_v14 = vld [vmem:[%s663_s3 + $0x18] sm:$0xff]  ;;  %v89_v15 = vld [vmem:[%s663_s3 + $0x10] sm:$0xff]  ;;  %p446_p10 = scmp.ne.s32.totalorder %s332_s20, %s445_s21  ;;  %p451_p12 = scmp.lt.s32.totalorder %s445_s21, %s445_s21 }
  0x1f   :  { %v88_v16 = vld [vmem:[%s663_s3 + $0x8] sm:$0xff]  ;;  %v87_v17 = vld [vmem:[%s663_s3] sm:$0xff]  ;;  %v70_v23 = vld [vmem:[%s661_s1 + $0x78] sm:$0xff] }
  0x20   :  { %176 = vperm.xlu0 %403, %v101_v3   ;;  %166 = vperm.xlu1 %404, %v99_v4   ;;  %v573_v18 = vld [vmem:[%s664_s4] ss:$0 sm:$0xff]  ;;  %v84_v26 = vld [vmem:[#allocation6 + $0x68] sm:$0xff]  ;;  %v85_v28 = vld [vmem:[#allocation6 + $0x70] sm:$0xff]  ;;  %p452_p13 = por %p451_p12, %p450_p11 }
  0x21   :  { %v86_v20 = vld [vmem:[#allocation6 + $0x78] sm:$0xff]  ;;  %v69_v31 = vld [vmem:[%s661_s1 + $0x70] sm:$0xff]  ;;  %v68_v35 = vld [vmem:[%s661_s1 + $0x68] sm:$0xff] }
  0x22   :  { %v83_v38 = vld [vmem:[#allocation6 + $0x60] sm:$0xff]  ;;  %v82_v43 = vld [vmem:[#allocation6 + $0x58] sm:$0xff]  ;;  %v81_v49 = vld [vmem:[#allocation6 + $0x50] sm:$0xff]  ;;  %p453_p0 = pnand %p452_p13, %p446_p10 }
  0x23   :  { %v67_v45 = vld [vmem:[%s661_s1 + $0x60] sm:$0xff]  ;;  %v66_v51 = vld [vmem:[%s661_s1 + $0x58] sm:$0xff]  ;;  %v80_v55 = vld [vmem:[#allocation6 + $0x48] sm:$0xff] }
  0x24   :  { %161 = vperm.xlu0 %403, %v98_v6   ;;  %156 = vperm.xlu1 %404, %v97_v7   ;;  %v65_v57 = vld [vmem:[%s661_s1 + $0x50] sm:$0xff]  ;;  %v79_v61 = vld [vmem:[#allocation6 + $0x40] sm:$0xff]  ;;  %v78_v3 = vld [vmem:[#allocation6 + $0x38] sm:$0xff] }
  0x25   :  { %v64_v63 = vld [vmem:[%s661_s1 + $0x48] sm:$0xff]  ;;  %v63_v6 = vld [vmem:[%s661_s1 + $0x40] sm:$0xff] }
  0x28   :  { %151 = vperm.xlu0 %403, %v96_v8   ;;  %146 = vperm.xlu1 %404, %v95_v9  }
  0x2c   :  { %141 = vperm.xlu0 %403, %v94_v10   ;;  %136 = vperm.xlu1 %404, %v93_v11   ;;  %v77_v10 = vld [vmem:[#allocation6 + $0x30] sm:$0xff] }
  0x30   :  { %131 = vperm.xlu0 %403, %v92_v12   ;;  %126 = vperm.xlu1 %404, %v91_v13   ;;  %v62_v12 = vld [vmem:[%s661_s1 + $0x38] sm:$0xff] }
  0x34   :  { %121 = vperm.xlu0 %403, %v90_v14   ;;  %116 = vperm.xlu1 %404, %v89_v15  }
  0x38   :  { %111 = vperm.xlu0 %403, %v88_v16   ;;  %106 = vperm.xlu1 %404, %v87_v17   ;;  %v76_v16 = vld [vmem:[#allocation6 + $0x28] sm:$0xff] }
  0x97   :  { %v182_v19 = vpop.permute.xlu0 %181  ;;  %v172_v22 = vpop.permute.xlu1 %171 }
  0x98   :  { %v205_v21 = vmul.f32 %v573_v18, %v182_v19  ;;  %v203_v25 = vmul.f32 %v573_v18, %v172_v22  ;;  %v61_v19 = vld [vmem:[%s661_s1 + $0x30] sm:$0xff] }
  0x9a   :  { %v221_v24 = vmul.f32 %v205_v21, %v86_v20  ;;  %v219_v32 = vmul.f32 %v203_v25, %v84_v26  ;;  %v60_v25 = vld [vmem:[%s661_s1 + $0x28] sm:$0xff] }
  0x9b   :  { %v177_v27 = vpop.permute.xlu0 %176  ;;  %v167_v34 = vpop.permute.xlu1 %166 }
  0x9c   :  { %v204_v29 = vmul.f32 %v573_v18, %v177_v27  ;;  %v237_v30 = vadd.f32 %v221_v24, %v70_v23  ;;  %v202_v36 = vmul.f32 %v573_v18, %v167_v34  ;;  %v235_v40 = vadd.f32 %v219_v32, %v68_v35  ;;  %v75_v23 = vld [vmem:[#allocation6 + $0x20] sm:$0xff]  ;;  %v73_v35 = vld [vmem:[#allocation6 + $0x10] sm:$0xff] }
  0x9e   :  { %v220_v33 = vmul.f32 %v204_v29, %v85_v28  ;;  %361 = vmatpush3.xpose.msra.mxu0 %v237_v30  ;;  %v218_v41 = vmul.f32 %v202_v36, %v83_v38  ;;  %v74_v29 = vld [vmem:[#allocation6 + $0x18] sm:$0xff] }
  0x9f   :  { %362 = vmatprep.subr.mxu0 %v476_v5  ;;  %v162_v39 = vpop.permute.xlu0 %161  ;;  %v157_v44 = vpop.permute.xlu1 %156 }
  0xa0   :  { %v236_v37 = vadd.f32 %v220_v33, %v69_v31  ;;  %v201_v42 = vmul.f32 %v573_v18, %v162_v39  ;;  %v200_v47 = vmul.f32 %v573_v18, %v157_v44  ;;  %v234_v48 = vadd.f32 %v218_v41, %v67_v45  ;;  %v59_v31 = vld [vmem:[%s661_s1 + $0x20] sm:$0xff]  ;;  %v72_v41 = vld [vmem:[#allocation6 + $0x8] sm:$0xff] }
  0xa2   :  { %363 = vmatpush3.xpose.msra.mxu0 %v236_v37  ;;  %v217_v46 = vmul.f32 %v201_v42, %v82_v43  ;;  %v216_v52 = vmul.f32 %v200_v47, %v81_v49  ;;  %v58_v37 = vld [vmem:[%s661_s1 + $0x18] sm:$0xff]  ;;  %v57_v43 = vld [vmem:[%s661_s1 + $0x10] sm:$0xff]  ;;  %v71_v47 = vld [vmem:[#allocation6] sm:$0xff] }
  0xa3   :  { %364 = vmatprep.subr.mxu0 %v476_v5  ;;  %v152_v50 = vpop.permute.xlu0 %151  ;;  %v147_v56 = vpop.permute.xlu1 %146 }
  0xa4   :  { %v199_v53 = vmul.f32 %v573_v18, %v152_v50  ;;  %v233_v54 = vadd.f32 %v217_v46, %v66_v51  ;;  %v198_v59 = vmul.f32 %v573_v18, %v147_v56  ;;  %v232_v60 = vadd.f32 %v216_v52, %v65_v57  ;;  %v55_v51 = vld [vmem:[%s661_s1] sm:$0xff] }
  0xa6   :  { %365 = vmatpush3.xpose.msra.mxu0 %v235_v40  ;;  %v215_v58 = vmul.f32 %v199_v53, %v80_v55  ;;  %v214_v0 = vmul.f32 %v198_v59, %v79_v61  ;;  %v342_v53 = vld [vmem:[%s665_s5] ss:$0 sm:$0xff] }
  0xa7   :  { %366 = vmatprep.subr.mxu0 %v476_v5  ;;  %v142_v62 = vpop.permute.xlu0 %141  ;;  %v137_v4 = vpop.permute.xlu1 %136 }
  0xa8   :  { %v197_v1 = vmul.f32 %v573_v18, %v142_v62  ;;  %v231_v2 = vadd.f32 %v215_v58, %v64_v63  ;;  %v196_v8 = vmul.f32 %v573_v18, %v137_v4  ;;  %v230_v9 = vadd.f32 %v214_v0, %v63_v6 }
  0xaa   :  { %367 = vmatpush3.xpose.msra.mxu0 %v234_v48  ;;  %v213_v7 = vmul.f32 %v197_v1, %v78_v3  ;;  %v212_v13 = vmul.f32 %v196_v8, %v77_v10  ;;  %v56_v48 = vld [vmem:[%s661_s1 + $0x8] sm:$0xff] }
  0xab   :  { %368 = vmatprep.subr.mxu0 %v476_v5  ;;  %v132_v11 = vpop.permute.xlu0 %131  ;;  %v127_v17 = vpop.permute.xlu1 %126 }
  0xac   :  { %v195_v14 = vmul.f32 %v573_v18, %v132_v11  ;;  %v229_v15 = vadd.f32 %v213_v7, %v62_v12  ;;  %v194_v21 = vmul.f32 %v573_v18, %v127_v17  ;;  %v228_v22 = vadd.f32 %v212_v13, %v61_v19 }
  0xae   :  { %369 = vmatpush3.xpose.msra.mxu0 %v233_v54  ;;  %v211_v20 = vmul.f32 %v195_v14, %v76_v16  ;;  %v210_v26 = vmul.f32 %v194_v21, %v75_v23 }
  0xaf   :  { %370 = vmatprep.subr.mxu0 %v476_v5  ;;  %v122_v24 = vpop.permute.xlu0 %121  ;;  %v117_v30 = vpop.permute.xlu1 %116 }
  0xb0   :  { %v193_v27 = vmul.f32 %v573_v18, %v122_v24  ;;  %v227_v28 = vadd.f32 %v211_v20, %v60_v25  ;;  %v192_v33 = vmul.f32 %v573_v18, %v117_v30  ;;  %v226_v34 = vadd.f32 %v210_v26, %v59_v31 }
  0xb2   :  { %371 = vmatpush3.xpose.msra.mxu0 %v232_v60  ;;  %v209_v32 = vmul.f32 %v193_v27, %v74_v29  ;;  %v208_v38 = vmul.f32 %v192_v33, %v73_v35 }
  0xb3   :  { %372 = vmatprep.subr.mxu0 %v476_v5  ;;  %v112_v36 = vpop.permute.xlu0 %111  ;;  %v107_v42 = vpop.permute.xlu1 %106 }
  0xb4   :  { %v191_v39 = vmul.f32 %v573_v18, %v112_v36  ;;  %v225_v40 = vadd.f32 %v209_v32, %v58_v37  ;;  %v190_v45 = vmul.f32 %v573_v18, %v107_v42  ;;  %v224_v46 = vadd.f32 %v208_v38, %v57_v43  ;;  %v239_v18 = vld [vmem:[#allocation3] sm:$0xff] }
  0xb6   :  { %373 = vmatpush3.xpose.msra.mxu0 %v231_v2  ;;  %v207_v44 = vmul.f32 %v191_v39, %v72_v41  ;;  %v206_v49 = vmul.f32 %v190_v45, %v71_v47 }
  0xb7   :  { %374 = vmatprep.subr.mxu0 %v476_v5 }
  0xb8   :  { %v223_v50 = vadd.f32 %v207_v44, %v56_v48  ;;  %v222_v52 = vadd.f32 %v206_v49, %v55_v51 }
  0xba   :  { %375 = vmatpush3.xpose.msra.mxu0 %v230_v9 }
  0xbb   :  { %376 = vmatprep.subr.mxu0 %v476_v5 }
  0xbe   :  { %377 = vmatpush3.xpose.msra.mxu0 %v229_v15 }
  0xbf   :  { %378 = vmatprep.subr.mxu0 %v476_v5 }
  0xc2   :  { %379 = vmatpush3.xpose.msra.mxu0 %v228_v22 }
  0xc3   :  { %380 = vmatprep.subr.mxu0 %v476_v5 }
  0xc6   :  { %381 = vmatpush3.xpose.msra.mxu0 %v227_v28 }
  0xc7   :  { %382 = vmatprep.subr.mxu0 %v476_v5 }
  0xca   :  { %383 = vmatpush3.xpose.msra.mxu0 %v226_v34 }
  0xcb   :  { %384 = vmatprep.subr.mxu0 %v476_v5 }
  0xce   :  { %385 = vmatpush3.xpose.msra.mxu0 %v225_v40 }
  0xcf   :  { %386 = vmatprep.subr.mxu0 %v476_v5 }
  0xd2   :  { %387 = vmatpush3.xpose.msra.mxu0 %v224_v46 }
  0xd3   :  { %388 = vmatprep.subr.mxu0 %v476_v5 }
  0xd6   :  { %389 = vmatpush3.xpose.msra.mxu0 %v223_v50 }
  0xd7   :  { %390 = vmatprep.subr.mxu0 %v476_v5 }
  0xda   :  { %391 = vmatpush3.xpose.msra.mxu0 %v222_v52 }
  0xdd   :  { %393 = vmatmul.mubr.f32.vlgmr.msra.gmra.mxu0 %v239_v18 }
 0x19d   :  { %v306_v54 = vpop.f32.mrf.mxu0 }
 0x19e   :  { %v323_v55 = vadd.f32 %v342_v53, %v306_v54 }
 0x19f   :  { %v394_v56 = vpop.f32.mrf.mxu0 }
 0x1a0   :  { %324 = vst [vmem:[#allocation8] sm:$0xff] %v323_v55 }
 0x1a1   :  { %456 = shalt.err (!%p453_p0)
}
 0x1a2   :  { %334 = dma.vmem_to_hbm [thread:$0]  %s332_s20, 128, %s666_s6, [#allocation5]  }
 0x1a3   :  { %469 = dma.done.wait [#allocation5], 128  }
 0x1a4   :  { %470 = vsyncadd [#allocation5], 4294967168 }
 0x1a5   :  { %338 = vsyncpa [#allocation4], 1 }
 0x1a6   :  { %339 = vsyncpa [#allocation7], 1 }
 0x1a7   :  { %340 = vsyncpa [#allocation5], 1 }

</bundles_post_ra>
